<compile_context>
chip_gen: v7x
topology: tpu7x:2x2x1
jax: 0.10.0
libtpu: 0.0.40
codegen_flags: <defaults>
</compile_context>

<pallas_src>
import numpy as np
import jax
import jax.numpy as jnp
from jax.experimental import pallas as pl
from jax.experimental.pallas import tpu as pltpu

EOS_COEF = 0.1     # cfg.SOLVER.EOS_COEF
SIGMA = 2.0        # cfg.SOLVER.SIGMA
EPS = 1e-6
LANE = 128
MAX_ATTN_TILE_ROWS = 512          # upper bound on attention row tile
ATTN_TILE_BYTE_BUDGET = 8 << 20   # ~8 MiB for the double-buffered attn stream


def _round_up(x, m):
    return ((x + m - 1) // m) * m


# ----------------------------------------------------------------------------
# Pallas kernel (factory: normalizers are static and baked in as reciprocals)
# ----------------------------------------------------------------------------
def _make_kernel(inv_norm, inv_bt, attn_scale):
    inv_norm = float(inv_norm)       # 1 / max(#actioness frames, 1)
    inv_bt = float(inv_bt)           # 1 / (B * T_original)
    attn_scale = float(attn_scale)   # 1 / ((nb_neg + eps) * B), or 0 if nb_neg == 0

    def kernel(box_ref,    # VMEM (8, Npad)        rows 0-3 pred cx,cy,w,h / 4-7 target
               slab_ref,   # VMEM (16, Tpad)       rows 0-2 logits(act,start,end),
               #                                     3-5 targets, 6-8 weights, 9 time_mask
               attn_ref,   # VMEM (TILE, Tpad)     negative-row block of attention weights
               out_ref,    # SMEM (8,)  [bbox, giou, actioness, sted, guided_attn, 0,0,0]
               acc_ref):   # VMEM (1, Tpad)        guided-attn per-column running sums
        r = pl.program_id(0)

        # ------------------------------------------------------------------
        # One-shot work hides under the first attention tile's DMA fill.
        # ------------------------------------------------------------------
        @pl.when(r == 0)
        def _prologue():
            acc_ref[...] = jnp.zeros_like(acc_ref)

            # ---------------- loss_boxes: L1 + GIoU (lane-dense) -----------
            bx = box_ref[...]                           # (8, Npad)
            s, t = bx[0:4, :], bx[4:8, :]               # (4, Npad) each
            out_ref[0] = jnp.sum(jnp.abs(s - t)) * inv_norm      # loss_bbox

            sx0 = s[0:1] - 0.5 * s[2:3]
            sy0 = s[1:2] - 0.5 * s[3:4]
            sx1 = s[0:1] + 0.5 * s[2:3]
            sy1 = s[1:2] + 0.5 * s[3:4]
            tx0 = t[0:1] - 0.5 * t[2:3]
            ty0 = t[1:2] - 0.5 * t[3:4]
            tx1 = t[0:1] + 0.5 * t[2:3]
            ty1 = t[1:2] + 0.5 * t[3:4]

            area_s = (sx1 - sx0) * (sy1 - sy0)
            area_t = (tx1 - tx0) * (ty1 - ty0)
            iw = jnp.maximum(jnp.minimum(sx1, tx1) - jnp.maximum(sx0, tx0), 0.0)
            ih = jnp.maximum(jnp.minimum(sy1, ty1) - jnp.maximum(sy0, ty0), 0.0)
            inter = iw * ih
            union = area_s + area_t - inter
            iou = inter / jnp.maximum(union, EPS)       # eps-guarded
            area_e = ((jnp.maximum(sx1, tx1) - jnp.minimum(sx0, tx0)) *
                      (jnp.maximum(sy1, ty1) - jnp.minimum(sy0, ty0)))
            giou = iou - (area_e - union) / jnp.maximum(area_e, EPS)
            out_ref[1] = jnp.sum(1.0 - giou) * inv_norm          # loss_giou

            # ---- BCE-with-logits for actioness / start / end in one fused
            #      EUP-contiguous expression over the packed (16, Tpad) slab --
            sl = slab_ref[...]
            logits = sl[0:3, :]
            tgts = sl[3:6, :]
            wts = sl[6:9, :]
            tm = sl[9:10, :]
            # max(x,0) - x*y + log(1 + exp(-|x|)), same math as torch BCEWithLogits
            bce = (jnp.maximum(logits, 0.0) - logits * tgts +
                   jnp.log(1.0 + jnp.exp(-jnp.abs(logits)))) * wts * tm
            out_ref[2] = jnp.sum(bce[0:1, :]) * inv_bt           # loss_actioness
            out_ref[3] = jnp.sum(bce[1:3, :]) * inv_bt           # loss_sted
            out_ref[5] = jnp.float32(0.0)
            out_ref[6] = jnp.float32(0.0)
            out_ref[7] = jnp.float32(0.0)

        # ------------------------------------------------------------------
        # Guided attention: only negative rows are ever streamed.  Padded
        # rows/columns hold EPS so (1-w)+EPS == 1.0 exactly -> -log == 0.
        # Per step: one log per surviving element + a sublane reduce into a
        # (1, Tpad) VMEM accumulator (no SMEM scalar round trip, no nm
        # lane<->sublane broadcast).
        # ------------------------------------------------------------------
        w = attn_ref[...]                               # (TILE, Tpad)
        lattn = -jnp.log((1.0 - w) + EPS)               # EUP log
        acc_ref[...] = acc_ref[...] + jnp.sum(lattn, axis=0, keepdims=True)

        @pl.when(r == pl.num_programs(0) - 1)
        def _finalize():
            # time-mask row (lane-aligned) zeroes padded columns exactly.
            col_mask = slab_ref[9:10, :]                # (1, Tpad)
            out_ref[4] = jnp.sum(acc_ref[...] * col_mask) * attn_scale

    return kernel


def _videostg_pallas(box_slab, slab, attn_rows,
                     inv_norm, inv_bt, attn_scale, tile_rows):
    rows_pad, t_pad = attn_rows.shape
    assert rows_pad % tile_rows == 0
    n_blk = rows_pad // tile_rows
    n_pad = box_slab.shape[1]
    kernel = _make_kernel(inv_norm, inv_bt, attn_scale)
    return pl.pallas_call(
        kernel,
        out_shape=jax.ShapeDtypeStruct((8,), jnp.float32),
        grid=(n_blk,),
        in_specs=[
            pl.BlockSpec((8, n_pad), lambda r: (0, 0)),          # boxes (resident)
            pl.BlockSpec((16, t_pad), lambda r: (0, 0)),         # per-frame slab (resident)
            pl.BlockSpec((tile_rows, t_pad), lambda r: (r, 0)),  # attn neg-row block
        ],
        out_specs=pl.BlockSpec(memory_space=pltpu.MemorySpace.SMEM),
        scratch_shapes=[pltpu.VMEM((1, t_pad), jnp.float32)],
        compiler_params=pltpu.CompilerParams(
            dimension_semantics=("arbitrary",),
            vmem_limit_bytes=32 * 1024 * 1024),
    )(box_slab, slab, attn_rows)


# ----------------------------------------------------------------------------
# Host glue mirroring VideoSTGLoss.forward (losses = boxes, sted, guided_attn,
# actioness; aux_outputs handled trivially as an empty list).
# ----------------------------------------------------------------------------
def videostg_loss_forward(outputs, targets, durations,
                          sigma=SIGMA, eos_coef=EOS_COEF):
    b = len(durations)
    assert b == 1, "reference loss_sted only supports batch size 1"
    T = int(max(durations))
    t_pad = _round_up(T, LANE)

    # --- host bookkeeping the eager PyTorch reference also does on CPU ---
    actioness = np.asarray(targets[0]['actioness'])
    inter = np.where(actioness)[0]
    t0, t1 = int(inter[0]), int(inter[-1])
    n_sel = t1 - t0 + 1
    n_pad = _round_up(n_sel, LANE)
    norm = float(max(len(inter), 1))

    ori = np.asarray(targets[0]['ori_actioness'])
    gt_frame = int(np.nonzero(ori)[0][0])
    ar = np.arange(T)

    start_d = np.exp(-(ar - t0) ** 2 / (2.0 * sigma ** 2))
    start_d[gt_frame:] = 0.0
    end_d = np.exp(-(ar - t1) ** 2 / (2.0 * sigma ** 2))
    end_d[:gt_frame] = 0.0
    start_pos = (start_d > 0.5).astype(np.float32)
    end_pos = (end_d > 0.5).astype(np.float32)
    k_start = max(round(int(start_pos.sum()) * 0.51), 1)   # same Python round as ref
    k_end = max(round(int(end_pos.sum()) * 0.51), 1)

    time_mask = np.zeros((1, T), np.float32)
    time_mask[0, :durations[0]] = 1.0
    act_w = np.full((1, T), eos_coef, np.float32)
    act_w[0, t0:t1 + 1] = 1.0
    positive = np.zeros(T, np.float32)
    positive[t0:t1 + 1] = 1.0
    pos_or = np.maximum(positive, 1.0 - time_mask[0])       # positive_map | ~time_mask
    nb_neg = int(np.sum(1.0 - pos_or))                      # == T - n_sel for B=1

    # ---- adaptive attention-row tiling (only negative rows are streamed) ----
    rows8 = max(_round_up(max(nb_neg, 1), 8), 8)
    tile_cap = max(8, ((ATTN_TILE_BYTE_BUDGET // (2 * 4 * t_pad)) // 8) * 8)
    tile_rows = int(min(rows8, MAX_ATTN_TILE_ROWS, tile_cap))
    rows_pad = _round_up(rows8, tile_rows)

    inv_norm = 1.0 / norm
    inv_bt = 1.0 / float(b * T)                              # ORIGINAL B*T divisor
    attn_scale = 0.0 if nb_neg == 0 else 1.0 / ((float(nb_neg) + EPS) * float(b))

    tm_const = jnp.asarray(time_mask)
    start_pos_j = jnp.asarray(start_pos)
    end_pos_j = jnp.asarray(end_pos)
    act_w_j = jnp.asarray(act_w[0])
    actioness_j = jnp.asarray(actioness.astype(np.float32))

    def _device(pred_boxes, tgt_boxes, pred_act, pred_sted, attn):
        f32 = jnp.float32
        # ---- boxes -> coordinate-major (8, Npad) slab (coords on sublanes) ----
        src = pred_boxes[t0:t1 + 1].astype(f32).T            # (4, n_sel)
        tgt = tgt_boxes.astype(f32).T                        # (4, n_sel)
        pad_box = jnp.broadcast_to(
            jnp.array([[0.5], [0.5], [1.0], [1.0]], f32), (4, n_pad - n_sel))
        box_slab = jnp.concatenate(
            [jnp.concatenate([src, pad_box], axis=1),
             jnp.concatenate([tgt, pad_box], axis=1)], axis=0)   # (8, Npad)

        # ---- sted mask-fill + sigmoid + dynamic-k top-k (all on device) ----
        sted = jnp.where(tm_const[:, :, None] > 0.0, pred_sted.astype(f32), -1e32)
        start_logits = sted[0, :, 0]
        end_logits = sted[0, :, 1]
        _, s_idx = jax.lax.top_k(jax.nn.sigmoid(start_logits) * start_pos_j, k_start)
        _, e_idx = jax.lax.top_k(jax.nn.sigmoid(end_logits) * end_pos_j, k_end)
        start_w = jnp.full((T,), eos_coef, f32).at[s_idx].set(1.0)
        start_t = jnp.zeros((T,), f32).at[s_idx].set(1.0)
        end_w = jnp.full((T,), eos_coef, f32).at[e_idx].set(1.0)
        end_t = jnp.zeros((T,), f32).at[e_idx].set(1.0)

        # ---- packed per-frame slab (16, Tpad); zero padding is neutral
        #      because the time-mask row is zero outside [0, T) ----
        rows = jnp.stack([
            pred_act.astype(f32)[0, :, 0], start_logits, end_logits,   # logits
            actioness_j, start_t, end_t,                               # targets
            act_w_j, start_w, end_w,                                   # weights
            tm_const[0],                                               # time mask
        ], axis=0)                                                     # (10, T)
        slab = jnp.zeros((16, t_pad), f32).at[:10, :T].set(rows)

        # ---- attention: keep only negative rows (static slices, B=1),
        #      pad rows/cols with EPS so padded elements contribute 0 ----
        attn0 = attn[0].astype(f32)                                    # (T, T)
        neg_rows = jnp.concatenate([attn0[:t0], attn0[t1 + 1:T]], axis=0)  # (nb_neg, T)
        attn_p = jnp.pad(neg_rows,
                         ((0, rows_pad - nb_neg), (0, t_pad - T)),
                         constant_values=EPS)                          # (rows_pad, Tpad)

        return _videostg_pallas(box_slab, slab, attn_p,
                                inv_norm, inv_bt, attn_scale, tile_rows)

    # NOTE: retraces when the data-dependent static config (T, t0, t1, k_*)
    # changes -- the same per-example host bookkeeping the eager reference does.
    out = jax.jit(_device)(
        jnp.asarray(outputs['pred_boxes']),
        jnp.asarray(targets[0]['boxs_bbox']),
        jnp.asarray(outputs['pred_actioness']),
        jnp.asarray(outputs['pred_sted']),
        jnp.asarray(outputs['weights']))

    return {'loss_bbox': out[0], 'loss_giou': out[1], 'loss_actioness': out[2],
            'loss_sted': out[3], 'loss_guided_attn': out[4]}


# ----------------------------------------------------------------------------
# Pure-numpy reference (float64) mirroring the PyTorch semantics, for checking
# ----------------------------------------------------------------------------
def _sigmoid(x):
    return 1.0 / (1.0 + np.exp(-x))


def reference_forward(outputs, targets, durations,
                      sigma=SIGMA, eos_coef=EOS_COEF):
    b = len(durations)
    T = max(durations)
    actioness = np.asarray(targets[0]['actioness'])
    inter = np.where(actioness)[0]
    t0, t1 = int(inter[0]), int(inter[-1])
    gt_slice = np.arange(t0, t1 + 1)
    norm = max(len(inter), 1)

    pb = np.asarray(outputs['pred_boxes'], np.float64)[gt_slice]
    tb = np.asarray(targets[0]['boxs_bbox'], np.float64)

    def to_xyxy(bx):
        cx, cy, w, h = bx[:, 0], bx[:, 1], bx[:, 2], bx[:, 3]
        return np.stack([cx - 0.5 * w, cy - 0.5 * h, cx + 0.5 * w, cy + 0.5 * h], -1)

    s, t = to_xyxy(pb), to_xyxy(tb)
    area_s = (s[:, 2] - s[:, 0]) * (s[:, 3] - s[:, 1])
    area_t = (t[:, 2] - t[:, 0]) * (t[:, 3] - t[:, 1])
    iw = np.clip(np.minimum(s[:, 2], t[:, 2]) - np.maximum(s[:, 0], t[:, 0]), 0, None)
    ih = np.clip(np.minimum(s[:, 3], t[:, 3]) - np.maximum(s[:, 1], t[:, 1]), 0, None)
    inter_a = iw * ih
    union = area_s + area_t - inter_a
    iou = inter_a / np.maximum(union, EPS)
    area_e = (np.maximum(s[:, 2], t[:, 2]) - np.minimum(s[:, 0], t[:, 0])) * \
             (np.maximum(s[:, 3], t[:, 3]) - np.minimum(s[:, 1], t[:, 1]))
    giou = iou - (area_e - union) / np.maximum(area_e, EPS)
    ref = {'loss_bbox': np.abs(pb - tb).sum() / norm,
           'loss_giou': (1 - giou).sum() / norm}

    time_mask = np.zeros((b, T), bool)
    time_mask[0, :durations[0]] = True
    positive_map = np.zeros((b, T), bool)
    positive_map[0, t0:t1 + 1] = True

    def bce(x, y):
        return np.maximum(x, 0) - x * y + np.log1p(np.exp(-np.abs(x)))

    pa = np.asarray(outputs['pred_actioness'], np.float64)[..., 0]
    ta = actioness.astype(np.float64)[None, :]
    w = np.full((b, T), eos_coef)
    w[0, t0:t1 + 1] = 1.0
    ref['loss_actioness'] = (bce(pa, ta) * w * time_mask).mean()

    ori = np.asarray(targets[0]['ori_actioness'])
    gt_frame = int(np.nonzero(ori)[0][0])
    sted = np.asarray(outputs['pred_sted'], np.float64)
    sted = np.where(time_mask[:, :, None], sted, -1e32)
    ar = np.arange(T)

    def sted_side(logits_bt, center, is_start):
        d = np.exp(-(ar - center) ** 2 / (2 * sigma ** 2))
        if is_start:
            d[gt_frame:] = 0.0
        else:
            d[:gt_frame] = 0.0
        pmask = (d > 0.5).astype(np.float64)
        pos_num = int(pmask.sum())
        k = max(round(pos_num * 0.51), 1)
        prob = _sigmoid(logits_bt[0]) * pmask
        idx = np.argsort(-prob)[:k]
        nw = np.full((b, T), eos_coef)
        tgt = np.zeros((b, T))
        nw[0, idx] = 1.0
        tgt[0, idx] = 1.0
        return bce(logits_bt, tgt) * nw * time_mask

    loss_start = sted_side(sted[:, :, 0], t0, True)
    loss_end = sted_side(sted[:, :, 1], t1, False)
    ref['loss_sted'] = (loss_start + loss_end).mean()

    pos_or = positive_map | (~time_mask)
    wts = np.asarray(outputs['weights'], np.float64)
    l = -np.log(1 - wts + 1e-6)
    l = l * (~pos_or)[:, :, None]
    nb_neg = (~pos_or).sum(1) + 1e-6
    l = l.sum(2) / nb_neg[:, None]
    ref['loss_guided_attn'] = l.sum(1).mean()
    return ref


# ----------------------------------------------------------------------------
if __name__ == "__main__":
    key = jax.random.PRNGKey(0)
    k1, k2, k3, k4, k5, k6, k7 = jax.random.split(key, 7)

    B, T = 1, 8
    durations = [T]
    actioness = np.array([0, 0, 1, 1, 1, 1, 0, 0], dtype=np.int32)
    Ngt = int(actioness.sum())

    # model outputs (synthetic, deterministic)
    pred_cxcy = jax.random.uniform(k1, (B * T, 2), minval=0.3, maxval=0.7)
    pred_wh = jax.random.uniform(k2, (B * T, 2), minval=0.1, maxval=0.3)
    pred_boxes = jnp.concatenate([pred_cxcy, pred_wh], axis=-1)        # (8, 4)
    pred_actioness = jax.random.normal(k3, (B, T, 1))                  # (1, 8, 1)
    pred_sted = jax.random.normal(k4, (B, T, 2))                       # (1, 8, 2)
    attn_weights = jax.random.uniform(k5, (B, T, T), minval=0.0, maxval=0.9)

    # targets
    tgt_cxcy = np.asarray(jax.random.uniform(k6, (Ngt, 2), minval=0.3, maxval=0.7))
    tgt_wh = np.asarray(jax.random.uniform(k7, (Ngt, 2), minval=0.1, maxval=0.3))
    tgt_boxes = np.concatenate([tgt_cxcy, tgt_wh], axis=-1)            # (4, 4)

    outputs = {'pred_boxes': pred_boxes,
               'pred_actioness': pred_actioness,
               'pred_sted': pred_sted,
               'weights': attn_weights,
               'aux_outputs': []}
    targets = [{'actioness': actioness,
                'ori_actioness': actioness,
                'boxs_bbox': tgt_boxes}]

    losses = videostg_loss_forward(outputs, targets, durations)
    losses = jax.block_until_ready(losses)

    ref = reference_forward(outputs, targets, durations)
    for name in ['loss_bbox', 'loss_giou', 'loss_actioness',
                 'loss_sted', 'loss_guided_attn']:
        np.testing.assert_allclose(np.asarray(losses[name]), ref[name],
                                   rtol=2e-3, atol=1e-5)

    print("KERNEL_OK")
</pallas_src>

<mosaic_0001>
module attributes {stable_mosaic.version = 11 : i64} {
  func.func @kernel(%arg0: i32, %arg1: memref<8x128xf32, #tpu.memory_space<vmem>>, %arg2: memref<16x128xf32, #tpu.memory_space<vmem>>, %arg3: memref<8x128xf32, #tpu.memory_space<vmem>>, %arg4: memref<8xf32, #tpu.memory_space<smem>>, %arg5: memref<1x128xf32, #tpu.memory_space<vmem>>) attributes {dimension_semantics = [#tpu.dimension_semantics<arbitrary>], iteration_bounds = array<i64: 1>, scalar_prefetch = 0 : i64, scratch_operands = 1 : i64, tpu.core_type = #tpu.core_type<tc>, window_params = [{pipeline_mode = #tpu.pipeline_mode<synchronous>, transform_indices = @transform_0, window_bounds = array<i64: 8, 128>}, {pipeline_mode = #tpu.pipeline_mode<synchronous>, transform_indices = @transform_1, window_bounds = array<i64: 16, 128>}, {transform_indices = @transform_2, window_bounds = array<i64: 8, 128>}, {transform_indices = @transform_3, window_bounds = array<i64: 8>}]} {
    %c0_i32 = arith.constant 0 : i32
    %0 = arith.cmpi eq, %arg0, %c0_i32 : i32
    %1 = arith.extui %0 : i1 to i32
    %c0_i32_0 = arith.constant 0 : i32
    %2 = arith.cmpi ne, %1, %c0_i32_0 : i32
    scf.if %2 {
      %cst_11 = arith.constant 0.000000e+00 : f32
      %19 = vector.broadcast %cst_11 : f32 to vector<1x128xf32>
      %c0_12 = arith.constant 0 : index
      %c0_13 = arith.constant 0 : index
      %20 = vector.load %arg5[%c0_12, %c0_13] : memref<1x128xf32, #tpu.memory_space<vmem>>, vector<1x128xf32>
      tpu.vector_store %arg5[%c0_12, %c0_13], %19 {strides = array<i32>} : memref<1x128xf32, #tpu.memory_space<vmem>>, vector<1x128xf32>,
      %c0_14 = arith.constant 0 : index
      %c0_15 = arith.constant 0 : index
      %21 = vector.load %arg1[%c0_14, %c0_15] : memref<8x128xf32, #tpu.memory_space<vmem>>, vector<8x128xf32>
      %22 = vector.extract_strided_slice %21 {offsets = [0, 0], sizes = [4, 128], strides = [1, 1]} : vector<8x128xf32> to vector<4x128xf32>
      %23 = vector.extract_strided_slice %21 {offsets = [4, 0], sizes = [4, 128], strides = [1, 1]} : vector<8x128xf32> to vector<4x128xf32>
      %24 = arith.subf %22, %23 : vector<4x128xf32>
      %25 = math.absf %24 : vector<4x128xf32>
      %26 = vector.shape_cast %25 : vector<4x128xf32> to vector<1x4x128xf32>
      %cst_16 = arith.constant dense<0.000000e+00> : vector<1xf32>
      %27 = vector.multi_reduction <add>, %26, %cst_16 [1, 2] : vector<1x4x128xf32> to vector<1xf32>
      %28 = vector.shape_cast %27 : vector<1xf32> to vector<1x1x1xf32>
      %29 = vector.extract %28[0, 0, 0] : f32 from vector<1x1x1xf32>
      %cst_17 = arith.constant 2.500000e-01 : f32
      %30 = arith.mulf %29, %cst_17 : f32
      %c0_18 = arith.constant 0 : index
      %31 = memref.load %arg4[%c0_18] : memref<8xf32, #tpu.memory_space<smem>>
      memref.store %30, %arg4[%c0_18] : memref<8xf32, #tpu.memory_space<smem>>
      %32 = vector.extract_strided_slice %22 {offsets = [0, 0], sizes = [1, 128], strides = [1, 1]} : vector<4x128xf32> to vector<1x128xf32>
      %33 = vector.extract_strided_slice %22 {offsets = [2, 0], sizes = [1, 128], strides = [1, 1]} : vector<4x128xf32> to vector<1x128xf32>
      %cst_19 = arith.constant 5.000000e-01 : f32
      %34 = vector.broadcast %cst_19 : f32 to vector<1x128xf32>
      %35 = arith.mulf %34, %33 : vector<1x128xf32>
      %36 = arith.subf %32, %35 : vector<1x128xf32>
      %37 = vector.extract_strided_slice %22 {offsets = [1, 0], sizes = [1, 128], strides = [1, 1]} : vector<4x128xf32> to vector<1x128xf32>
      %38 = vector.extract_strided_slice %22 {offsets = [3, 0], sizes = [1, 128], strides = [1, 1]} : vector<4x128xf32> to vector<1x128xf32>
      %cst_20 = arith.constant 5.000000e-01 : f32
      %39 = vector.broadcast %cst_20 : f32 to vector<1x128xf32>
      %40 = arith.mulf %39, %38 : vector<1x128xf32>
      %41 = arith.subf %37, %40 : vector<1x128xf32>
      %42 = vector.extract_strided_slice %22 {offsets = [0, 0], sizes = [1, 128], strides = [1, 1]} : vector<4x128xf32> to vector<1x128xf32>
      %43 = vector.extract_strided_slice %22 {offsets = [2, 0], sizes = [1, 128], strides = [1, 1]} : vector<4x128xf32> to vector<1x128xf32>
      %cst_21 = arith.constant 5.000000e-01 : f32
      %44 = vector.broadcast %cst_21 : f32 to vector<1x128xf32>
      %45 = arith.mulf %44, %43 : vector<1x128xf32>
      %46 = arith.addf %42, %45 : vector<1x128xf32>
      %47 = vector.extract_strided_slice %22 {offsets = [1, 0], sizes = [1, 128], strides = [1, 1]} : vector<4x128xf32> to vector<1x128xf32>
      %48 = vector.extract_strided_slice %22 {offsets = [3, 0], sizes = [1, 128], strides = [1, 1]} : vector<4x128xf32> to vector<1x128xf32>
      %cst_22 = arith.constant 5.000000e-01 : f32
      %49 = vector.broadcast %cst_22 : f32 to vector<1x128xf32>
      %50 = arith.mulf %49, %48 : vector<1x128xf32>
      %51 = arith.addf %47, %50 : vector<1x128xf32>
      %52 = vector.extract_strided_slice %23 {offsets = [0, 0], sizes = [1, 128], strides = [1, 1]} : vector<4x128xf32> to vector<1x128xf32>
      %53 = vector.extract_strided_slice %23 {offsets = [2, 0], sizes = [1, 128], strides = [1, 1]} : vector<4x128xf32> to vector<1x128xf32>
      %cst_23 = arith.constant 5.000000e-01 : f32
      %54 = vector.broadcast %cst_23 : f32 to vector<1x128xf32>
      %55 = arith.mulf %54, %53 : vector<1x128xf32>
      %56 = arith.subf %52, %55 : vector<1x128xf32>
      %57 = vector.extract_strided_slice %23 {offsets = [1, 0], sizes = [1, 128], strides = [1, 1]} : vector<4x128xf32> to vector<1x128xf32>
      %58 = vector.extract_strided_slice %23 {offsets = [3, 0], sizes = [1, 128], strides = [1, 1]} : vector<4x128xf32> to vector<1x128xf32>
      %cst_24 = arith.constant 5.000000e-01 : f32
      %59 = vector.broadcast %cst_24 : f32 to vector<1x128xf32>
      %60 = arith.mulf %59, %58 : vector<1x128xf32>
      %61 = arith.subf %57, %60 : vector<1x128xf32>
      %62 = vector.extract_strided_slice %23 {offsets = [0, 0], sizes = [1, 128], strides = [1, 1]} : vector<4x128xf32> to vector<1x128xf32>
      %63 = vector.extract_strided_slice %23 {offsets = [2, 0], sizes = [1, 128], strides = [1, 1]} : vector<4x128xf32> to vector<1x128xf32>
      %cst_25 = arith.constant 5.000000e-01 : f32
      %64 = vector.broadcast %cst_25 : f32 to vector<1x128xf32>
      %65 = arith.mulf %64, %63 : vector<1x128xf32>
      %66 = arith.addf %62, %65 : vector<1x128xf32>
      %67 = vector.extract_strided_slice %23 {offsets = [1, 0], sizes = [1, 128], strides = [1, 1]} : vector<4x128xf32> to vector<1x128xf32>
      %68 = vector.extract_strided_slice %23 {offsets = [3, 0], sizes = [1, 128], strides = [1, 1]} : vector<4x128xf32> to vector<1x128xf32>
      %cst_26 = arith.constant 5.000000e-01 : f32
      %69 = vector.broadcast %cst_26 : f32 to vector<1x128xf32>
      %70 = arith.mulf %69, %68 : vector<1x128xf32>
      %71 = arith.addf %67, %70 : vector<1x128xf32>
      %72 = arith.subf %46, %36 : vector<1x128xf32>
      %73 = arith.subf %51, %41 : vector<1x128xf32>
      %74 = arith.mulf %72, %73 : vector<1x128xf32>
      %75 = arith.subf %66, %56 : vector<1x128xf32>
      %76 = arith.subf %71, %61 : vector<1x128xf32>
      %77 = arith.mulf %75, %76 : vector<1x128xf32>
      %78 = arith.minimumf %46, %66 : vector<1x128xf32>
      %79 = arith.maximumf %36, %56 : vector<1x128xf32>
      %80 = arith.subf %78, %79 : vector<1x128xf32>
      %cst_27 = arith.constant 0.000000e+00 : f32
      %81 = vector.broadcast %cst_27 : f32 to vector<1x128xf32>
      %82 = arith.maximumf %80, %81 : vector<1x128xf32>
      %83 = arith.minimumf %51, %71 : vector<1x128xf32>
      %84 = arith.maximumf %41, %61 : vector<1x128xf32>
      %85 = arith.subf %83, %84 : vector<1x128xf32>
      %cst_28 = arith.constant 0.000000e+00 : f32
      %86 = vector.broadcast %cst_28 : f32 to vector<1x128xf32>
      %87 = arith.maximumf %85, %86 : vector<1x128xf32>
      %88 = arith.mulf %82, %87 : vector<1x128xf32>
      %89 = arith.addf %74, %77 : vector<1x128xf32>
      %90 = arith.subf %89, %88 : vector<1x128xf32>
      %cst_29 = arith.constant 9.99999997E-7 : f32
      %91 = vector.broadcast %cst_29 : f32 to vector<1x128xf32>
      %92 = arith.maximumf %90, %91 : vector<1x128xf32>
      %93 = arith.divf %88, %92 : vector<1x128xf32>
      %94 = arith.maximumf %46, %66 : vector<1x128xf32>
      %95 = arith.minimumf %36, %56 : vector<1x128xf32>
      %96 = arith.subf %94, %95 : vector<1x128xf32>
      %97 = arith.maximumf %51, %71 : vector<1x128xf32>
      %98 = arith.minimumf %41, %61 : vector<1x128xf32>
      %99 = arith.subf %97, %98 : vector<1x128xf32>
      %100 = arith.mulf %96, %99 : vector<1x128xf32>
      %101 = arith.subf %100, %90 : vector<1x128xf32>
      %cst_30 = arith.constant 9.99999997E-7 : f32
      %102 = vector.broadcast %cst_30 : f32 to vector<1x128xf32>
      %103 = arith.maximumf %100, %102 : vector<1x128xf32>
      %104 = arith.divf %101, %103 : vector<1x128xf32>
      %105 = arith.subf %93, %104 : vector<1x128xf32>
      %cst_31 = arith.constant 1.000000e+00 : f32
      %106 = vector.broadcast %cst_31 : f32 to vector<1x128xf32>
      %107 = arith.subf %106, %105 : vector<1x128xf32>
      %108 = vector.shape_cast %107 : vector<1x128xf32> to vector<1x1x128xf32>
      %cst_32 = arith.constant dense<0.000000e+00> : vector<1xf32>
      %109 = vector.multi_reduction <add>, %108, %cst_32 [1, 2] : vector<1x1x128xf32> to vector<1xf32>
      %110 = vector.shape_cast %109 : vector<1xf32> to vector<1x1x1xf32>
      %111 = vector.extract %110[0, 0, 0] : f32 from vector<1x1x1xf32>
      %cst_33 = arith.constant 2.500000e-01 : f32
      %112 = arith.mulf %111, %cst_33 : f32
      %c1 = arith.constant 1 : index
      %113 = memref.load %arg4[%c1] : memref<8xf32, #tpu.memory_space<smem>>
      memref.store %112, %arg4[%c1] : memref<8xf32, #tpu.memory_space<smem>>
      %c0_34 = arith.constant 0 : index
      %c0_35 = arith.constant 0 : index
      %114 = vector.load %arg2[%c0_34, %c0_35] : memref<16x128xf32, #tpu.memory_space<vmem>>, vector<16x128xf32>
      %115 = vector.extract_strided_slice %114 {offsets = [0, 0], sizes = [3, 128], strides = [1, 1]} : vector<16x128xf32> to vector<3x128xf32>
      %116 = vector.extract_strided_slice %114 {offsets = [3, 0], sizes = [3, 128], strides = [1, 1]} : vector<16x128xf32> to vector<3x128xf32>
      %117 = vector.extract_strided_slice %114 {offsets = [6, 0], sizes = [3, 128], strides = [1, 1]} : vector<16x128xf32> to vector<3x128xf32>
      %118 = vector.extract_strided_slice %114 {offsets = [9, 0], sizes = [1, 128], strides = [1, 1]} : vector<16x128xf32> to vector<1x128xf32>
      %cst_36 = arith.constant 0.000000e+00 : f32
      %119 = vector.broadcast %cst_36 : f32 to vector<3x128xf32>
      %120 = arith.maximumf %115, %119 : vector<3x128xf32>
      %121 = arith.mulf %115, %116 : vector<3x128xf32>
      %122 = arith.subf %120, %121 : vector<3x128xf32>
      %123 = math.absf %115 : vector<3x128xf32>
      %cst_37 = arith.constant 0.000000e+00 : f32
      %124 = vector.broadcast %cst_37 : f32 to vector<3x128xf32>
      %125 = arith.subf %124, %123 : vector<3x128xf32>
      %126 = math.exp %125 : vector<3x128xf32>
      %cst_38 = arith.constant 1.000000e+00 : f32
      %127 = vector.broadcast %cst_38 : f32 to vector<3x128xf32>
      %128 = arith.addf %127, %126 : vector<3x128xf32>
      %129 = math.log %128 : vector<3x128xf32>
      %130 = arith.addf %122, %129 : vector<3x128xf32>
      %131 = arith.mulf %130, %117 : vector<3x128xf32>
      %132 = vector.broadcast %118 : vector<1x128xf32> to vector<3x128xf32>
      %133 = arith.mulf %131, %132 : vector<3x128xf32>
      %134 = vector.extract_strided_slice %133 {offsets = [0, 0], sizes = [1, 128], strides = [1, 1]} : vector<3x128xf32> to vector<1x128xf32>
      %135 = vector.shape_cast %134 : vector<1x128xf32> to vector<1x1x128xf32>
      %cst_39 = arith.constant dense<0.000000e+00> : vector<1xf32>
      %136 = vector.multi_reduction <add>, %135, %cst_39 [1, 2] : vector<1x1x128xf32> to vector<1xf32>
      %137 = vector.shape_cast %136 : vector<1xf32> to vector<1x1x1xf32>
      %138 = vector.extract %137[0, 0, 0] : f32 from vector<1x1x1xf32>
      %cst_40 = arith.constant 1.250000e-01 : f32
      %139 = arith.mulf %138, %cst_40 : f32
      %c2 = arith.constant 2 : index
      %140 = memref.load %arg4[%c2] : memref<8xf32, #tpu.memory_space<smem>>
      memref.store %139, %arg4[%c2] : memref<8xf32, #tpu.memory_space<smem>>
      %141 = vector.extract_strided_slice %133 {offsets = [1, 0], sizes = [2, 128], strides = [1, 1]} : vector<3x128xf32> to vector<2x128xf32>
      %142 = vector.shape_cast %141 : vector<2x128xf32> to vector<1x2x128xf32>
      %cst_41 = arith.constant dense<0.000000e+00> : vector<1xf32>
      %143 = vector.multi_reduction <add>, %142, %cst_41 [1, 2] : vector<1x2x128xf32> to vector<1xf32>
      %144 = vector.shape_cast %143 : vector<1xf32> to vector<1x1x1xf32>
      %145 = vector.extract %144[0, 0, 0] : f32 from vector<1x1x1xf32>
      %cst_42 = arith.constant 1.250000e-01 : f32
      %146 = arith.mulf %145, %cst_42 : f32
      %c3 = arith.constant 3 : index
      %147 = memref.load %arg4[%c3] : memref<8xf32, #tpu.memory_space<smem>>
      memref.store %146, %arg4[%c3] : memref<8xf32, #tpu.memory_space<smem>>
      %cst_43 = arith.constant 0.000000e+00 : f32
      %c5 = arith.constant 5 : index
      %148 = memref.load %arg4[%c5] : memref<8xf32, #tpu.memory_space<smem>>
      memref.store %cst_43, %arg4[%c5] : memref<8xf32, #tpu.memory_space<smem>>
      %cst_44 = arith.constant 0.000000e+00 : f32
      %c6 = arith.constant 6 : index
      %149 = memref.load %arg4[%c6] : memref<8xf32, #tpu.memory_space<smem>>
      memref.store %cst_44, %arg4[%c6] : memref<8xf32, #tpu.memory_space<smem>>
      %cst_45 = arith.constant 0.000000e+00 : f32
      %c7 = arith.constant 7 : index
      %150 = memref.load %arg4[%c7] : memref<8xf32, #tpu.memory_space<smem>>
      memref.store %cst_45, %arg4[%c7] : memref<8xf32, #tpu.memory_space<smem>>
    } else {
    }
    %c0 = arith.constant 0 : index
    %c0_1 = arith.constant 0 : index
    %3 = vector.load %arg3[%c0, %c0_1] : memref<8x128xf32, #tpu.memory_space<vmem>>, vector<8x128xf32>
    %cst = arith.constant 1.000000e+00 : f32
    %4 = vector.broadcast %cst : f32 to vector<8x128xf32>
    %5 = arith.subf %4, %3 : vector<8x128xf32>
    %cst_2 = arith.constant 9.99999997E-7 : f32
    %6 = vector.broadcast %cst_2 : f32 to vector<8x128xf32>
    %7 = arith.addf %5, %6 : vector<8x128xf32>
    %8 = math.log %7 : vector<8x128xf32>
    %cst_3 = arith.constant 0.000000e+00 : f32
    %9 = vector.broadcast %cst_3 : f32 to vector<8x128xf32>
    %10 = arith.subf %9, %8 : vector<8x128xf32>
    %c0_4 = arith.constant 0 : index
    %c0_5 = arith.constant 0 : index
    %11 = vector.load %arg5[%c0_4, %c0_5] : memref<1x128xf32, #tpu.memory_space<vmem>>, vector<1x128xf32>
    %cst_6 = arith.constant dense<0.000000e+00> : vector<128xf32>
    %12 = vector.multi_reduction <add>, %10, %cst_6 [0] : vector<8x128xf32> to vector<128xf32>
    %13 = vector.shape_cast %12 : vector<128xf32> to vector<1x128xf32>
    %14 = arith.addf %11, %13 : vector<1x128xf32>
    %c0_7 = arith.constant 0 : index
    %c0_8 = arith.constant 0 : index
    %15 = vector.load %arg5[%c0_7, %c0_8] : memref<1x128xf32, #tpu.memory_space<vmem>>, vector<1x128xf32>
    tpu.vector_store %arg5[%c0_7, %c0_8], %14 {strides = array<i32>} : memref<1x128xf32, #tpu.memory_space<vmem>>, vector<1x128xf32>,
    %c0_i32_9 = arith.constant 0 : i32
    %16 = arith.cmpi eq, %arg0, %c0_i32_9 : i32
    %17 = arith.extui %16 : i1 to i32
    %c0_i32_10 = arith.constant 0 : i32
    %18 = arith.cmpi ne, %17, %c0_i32_10 : i32
    scf.if %18 {
      %c9 = arith.constant 9 : index
      %c0_11 = arith.constant 0 : index
      %19 = vector.load %arg2[%c9, %c0_11] : memref<16x128xf32, #tpu.memory_space<vmem>>, vector<1x128xf32>
      %c0_12 = arith.constant 0 : index
      %c0_13 = arith.constant 0 : index
      %20 = vector.load %arg5[%c0_12, %c0_13] : memref<1x128xf32, #tpu.memory_space<vmem>>, vector<1x128xf32>
      %21 = arith.mulf %20, %19 : vector<1x128xf32>
      %22 = vector.shape_cast %21 : vector<1x128xf32> to vector<1x1x128xf32>
      %cst_14 = arith.constant dense<0.000000e+00> : vector<1xf32>
      %23 = vector.multi_reduction <add>, %22, %cst_14 [1, 2] : vector<1x1x128xf32> to vector<1xf32>
      %24 = vector.shape_cast %23 : vector<1xf32> to vector<1x1x1xf32>
      %25 = vector.extract %24[0, 0, 0] : f32 from vector<1x1x1xf32>
      %cst_15 = arith.constant 0.24999994 : f32
      %26 = arith.mulf %25, %cst_15 : f32
      %c4 = arith.constant 4 : index
      %27 = memref.load %arg4[%c4] : memref<8xf32, #tpu.memory_space<smem>>
      memref.store %26, %arg4[%c4] : memref<8xf32, #tpu.memory_space<smem>>
    } else {
    }
    return
  }
  func.func @transform_0(%arg0: i32) -> (i32, i32) {
    %c0_i32 = arith.constant 0 : i32
    %c0_i32_0 = arith.constant 0 : i32
    %c0_i32_1 = arith.constant 0 : i32
    return %c0_i32, %c0_i32_0 : i32, i32
  }
  func.func @transform_1(%arg0: i32) -> (i32, i32) {
    %c0_i32 = arith.constant 0 : i32
    %c0_i32_0 = arith.constant 0 : i32
    %c0_i32_1 = arith.constant 0 : i32
    return %c0_i32, %c0_i32_0 : i32, i32
  }
  func.func @transform_2(%arg0: i32) -> (i32, i32) {
    %c0_i32 = arith.constant 0 : i32
    %c0_i32_0 = arith.constant 0 : i32
    return %arg0, %c0_i32 : i32, i32
  }
  func.func @transform_3(%arg0: i32) -> i32 {
    %c0_i32 = arith.constant 0 : i32
    %c0_i32_0 = arith.constant 0 : i32
    return %c0_i32 : i32
  }
}

</mosaic_0001>

<bundles_post_ra>
// kernel: _device.1
= control target key start
LH: loop header
LB: loop body
LE: loop exit
PB: predicated region body
PF: predicated region fallthrough
CT: control target
= control target key end

     0   :  { %s305_s0 = inlined_call_operand.vmem [shape: f32[8,128], index: 0, kind: input, shape index: {}]   ;;  %s306_s1 = inlined_call_operand.vmem [shape: f32[16,128], index: 1, kind: input, shape index: {}]   ;;  %s307_s2 = inlined_call_operand.vmem [shape: f32[8,128], index: 2, kind: input, shape index: {}]   ;;  %s308_s3 = inlined_call_operand.hbm [shape: f32[8], index: 3, kind: output, shape index: {}]  }
   0x1   :  { %v20_v0 = vld [vmem:[%s305_s0] sm:$0xff] }
   0x2   :  { %v275_v1 = vld [vmem:[%s306_s1] sm:$0xff]  ;;  %v22_v2 = vrot.slane %v20_v0, 4  ;;  %v40_v3 = vmul.f32 0.5, %v20_v0 }
   0x3   :  { %v163_v4 = vld [vmem:[%s307_s2] sm:$0xff]  ;;  %v108_v5 = vand.u32 2147483647, %v275_v1 }
   0x4   :  { %v24_v6 = vsub.f32 %v20_v0, %v22_v2  ;;  %v42_v7 = vrot.slane %v40_v3, 2 }
   0x5   :  { %8 = vsyncpa [#allocation4], 0  ;;  %vm26_vm0 = vcmask 1043456   ;;  %v109_v8 = vsub.f32 0.0, %v108_v5  ;;  %v246_v9 = vmov 0.0   ;;  %v164_v10 = vsub.f32 1.0, %v163_v4 }
   0x6   :  { %19 = vst [vmem:[#allocation2] sm:$0x1] %v246_v9  ;;  %v25_v11 = vand.u32 2147483647, %v24_v6  ;;  %v44_v12 = vsub.f32 %v20_v0, %v42_v7  ;;  %v45_v13 = vadd.f32 %v42_v7, %v20_v0  ;;  %v104_v42 = vrot.slane %v275_v1, 3  ;;  %v101_v46 = vld [vmem:[%s306_s1 + $0x8] sm:$0xff] }
   0x7   :  { %v110_v14 = vmul.f32 1.442695, %v109_v8  ;;  %v165_v15 = vadd.f32 1e-06, %v164_v10  ;;  %v123_v43 = vlaneseq  ;;  %v102_v47 = vmax.f32 %v275_v1, 0.0  ;;  %s247_s20 = smov 0.0  }
   0x8   :  { %v27_v16 = vsel %vm26_vm0, %v25_v11, 0.0  ;;  %v46_v17 = vsub.f32 %v45_v13, %v44_v12  ;;  %v52_v18 = vrot.slane %v45_v13, 4  ;;  %v56_v19 = vrot.slane %v44_v12, 4  ;;  %158 = sst [smem:[#allocation3 + $0x5]] %s247_s20  ;;  %s234_s5 = scalar_lea.hbm %s308_s3, 16 }
   0x9   :  { %28 = vadd.xlane.f32.xlu0 %v27_v16  ;;  %224 = vpow2.f32 %v110_v14  ;;  %v106_v48 = vmul.f32 %v104_v42, %v275_v1  ;;  %v124_v49 = vshrl.u32 %v123_v43, 7  ;;  %v118_v52 = vrot.slane %v275_v1, 6  ;;  %160 = sst [smem:[#allocation3 + $0x6]] %s247_s20  ;;  %p235_p0 = scmp.ne.s32.totalorder %s308_s3, %s234_s5 }
   0xa   :  { %v48_v20 = vrot.slane %v46_v17, 1  ;;  %v54_v21 = vmin.f32 %v45_v13, %v52_v18  ;;  %v58_v22 = vmax.f32 %v44_v12, %v56_v19  ;;  %v73_v23 = vmax.f32 %v45_v13, %v52_v18  ;;  %162 = sst [smem:[#allocation3 + $0x7]] %s247_s20  ;;  %p238_p1 = scmp.lt.u32.totalorder %s234_s5, %s308_s3 }
   0xb   :  { %v74_v24 = vmin.f32 %v44_v12, %v56_v19  ;;  %226 = vlog2.f32 %v165_v15  ;;  %v119_v53 = vrot.slane %v101_v46, 6  ;;  %v107_v56 = vsub.f32 %v102_v47, %v106_v48  ;;  %v181_v15 = vld [vmem:[%s306_s1 + $0x9] sm:$0x1] }
   0xc   :  { %v50_v25 = vmul.f32 %v48_v20, %v46_v17  ;;  %v59_v26 = vsub.f32 %v54_v21, %v58_v22  ;;  %vm117_vm1 = vcmask 1041408   ;;  %v125_v57 = vsub.s32 1, %v124_v49  ;;  %p240_p2 = pnand %p238_p1, %p235_p0 }
   0xd   :  { %v75_v27 = vsub.f32 %v73_v23, %v74_v24  ;;  %v120_v63 = vsel %vm117_vm1, %v118_v52, %v119_v53  ;;  %v169_v5 = vld [vmem:[#allocation2] sm:$0x1]  ;;  %vm86_vm2 = vcmask 1040384  }
   0xe   :  { %v60_v28 = vmax.f32 %v59_v26, 0.0  ;;  %v66_v29 = vrot.slane %v50_v25, 4  ;;  %v126_v3 = vrot.slane %v101_v46, %v125_v57 }
   0xf   :  { %v77_v30 = vrot.slane %v75_v27, 1 }
  0x10   :  { %v62_v31 = vrot.slane %v60_v28, 1  ;;  %v68_v32 = vadd.f32 %v66_v29, %v50_v25 }
  0x11   :  { %v79_v33 = vmul.f32 %v77_v30, %v75_v27 }
  0x12   :  { %v64_v34 = vmul.f32 %v62_v31, %v60_v28 }
  0x13   :  { %v225_v35 = vpop.eup %224  ;;  %v81_v36 = vmax.f32 %v79_v33, 1e-06 }
  0x14   :  { %v112_v37 = vadd.f32 1.0, %v225_v35  ;;  %v69_v38 = vsub.f32 %v68_v32, %v64_v34 }
  0x15   :  { %v227_v39 = vpop.eup %226  ;;  %228 = vrcp.f32 %v81_v36 }
  0x16   :  { %230 = vlog2.f32 %v112_v37  ;;  %v70_v40 = vmax.f32 %v69_v38, 1e-06  ;;  %v167_v41 = vmul.f32 0.6931472, %v227_v39  ;;  %v80_v51 = vsub.f32 %v79_v33, %v69_v38 }
  0x18   :  { %232 = vrcp.f32 %v70_v40  ;;  %v168_v44 = vsub.f32 0.0, %v167_v41 }
  0x1a   :  { %v170_v45 = vrot.slane %v168_v44, 4 }
  0x1c   :  { %v171_v50 = vadd.f32 %v170_v45, %v168_v44 }
  0x1e   :  { %v172_v54 = vrot.slane %v171_v50, 2 }
  0x1f   :  { %v229_v55 = vpop.eup %228 }
  0x20   :  { %v231_v58 = vpop.eup %230  ;;  %v173_v59 = vadd.f32 %v172_v54, %v171_v50  ;;  %v83_v61 = vmul.f32 %v229_v55, %v80_v51 }
  0x21   :  { %v114_v60 = vmul.f32 0.6931472, %v231_v58 }
  0x22   :  { %v233_v62 = vpop.eup %232  ;;  %v174_v0 = vrot.slane %v173_v59, 1 }
  0x23   :  { %v115_v2 = vadd.f32 %v114_v60, %v107_v56  ;;  %v72_v4 = vmul.f32 %v233_v62, %v64_v34 }
  0x24   :  { %v175_v6 = vadd.f32 %v174_v0, %v173_v59 }
  0x25   :  { %v122_v1 = vmul.f32 %v120_v63, %v115_v2  ;;  %v84_v7 = vsub.f32 %v72_v4, %v83_v61 }
  0x26   :  { %v176_v8 = vadd.f32 %v175_v6, %v169_v5 }
  0x27   :  { %v127_v9 = vmul.f32 %v126_v3, %v122_v1  ;;  %v85_v10 = vsub.f32 1.0, %v84_v7 }
  0x28   :  { %177 = vst [vmem:[#allocation2] sm:$0x1] %v176_v8 }
  0x29   :  { %v128_v11 = vsel %vm86_vm2, %v127_v9, 0.0  ;;  %v87_v12 = vsel %vm86_vm2, %v85_v10, 0.0  ;;  %v142_v13 = vrot.slane %v127_v9, 1 }
  0x2a   :  { %129 = vadd.xlane.f32.xlu1 %v128_v11  ;;  %88 = vadd.xlane.f32.xlu0 %v87_v12 }
  0x2b   :  { %v144_v14 = vsel %vm117_vm1, %v142_v13, 0.0 }
  0x2e   :  { %145 = vadd.xlane.f32.xlu1 %v144_v14 }
  0x2f   :  { %v182_v16 = vld [vmem:[#allocation2] sm:$0x1] }
  0x30   :  { %v183_v17 = vmul.f32 %v182_v16, %v181_v15 }
  0x32   :  { %v185_v18 = vsel %vm86_vm2, %v183_v17, 0.0 }
  0x33   :  { %186 = vadd.xlane.f32.xlu0 %v185_v18 }
  0x96   :  { %v29_v19 = vpop.xlane.xlu0 %28 }
  0x97   :  { %v30_v20 = vrot.slane %v29_v19, 4 }
  0x99   :  { %v31_v21 = vadd.f32 %v30_v20, %v29_v19 }
  0x9b   :  { %v32_v22 = vrot.slane %v31_v21, 2 }
  0x9d   :  { %v33_v23 = vadd.f32 %v32_v22, %v31_v21 }
  0x9f   :  { %v34_v24 = vrot.slane %v33_v23, 1 }
  0xa1   :  { %v35_v25 = vadd.f32 %v34_v24, %v33_v23 }
  0xa3   :  { %211 = vpush %v35_v25 }
  0xb7   :  { %v130_v26 = vpop.xlane.xlu1 %129  ;;  %v89_v27 = vpop.xlane.xlu0 %88 }
  0xb8   :  { %v131_v28 = vrot.slane %v130_v26, 4  ;;  %v90_v29 = vrot.slane %v89_v27, 4 }
  0xba   :  { %v132_v30 = vadd.f32 %v131_v28, %v130_v26  ;;  %v91_v31 = vadd.f32 %v90_v29, %v89_v27 }
  0xbb   :  { %v146_v32 = vpop.xlane.xlu1 %145 }
  0xbc   :  { %v133_v33 = vrot.slane %v132_v30, 2  ;;  %v92_v34 = vrot.slane %v91_v31, 2  ;;  %v147_v35 = vrot.slane %v146_v32, 4 }
  0xbe   :  { %v148_v36 = vadd.f32 %v147_v35, %v146_v32  ;;  %v93_v37 = vadd.f32 %v92_v34, %v91_v31  ;;  %v134_v38 = vadd.f32 %v133_v33, %v132_v30 }
  0xc0   :  { %v149_v39 = vrot.slane %v148_v36, 2  ;;  %v187_v40 = vpop.xlane.xlu0 %186  ;;  %v94_v41 = vrot.slane %v93_v37, 1  ;;  %v135_v42 = vrot.slane %v134_v38, 1 }
  0xc1   :  { %v188_v43 = vrot.slane %v187_v40, 4 }
  0xc2   :  { %v150_v44 = vadd.f32 %v149_v39, %v148_v36  ;;  %v95_v45 = vadd.f32 %v94_v41, %v93_v37  ;;  %v136_v46 = vadd.f32 %v135_v42, %v134_v38 }
  0xc3   :  { %v189_v47 = vadd.f32 %v188_v43, %v187_v40 }
  0xc4   :  { %213 = vpush %v95_v45  ;;  %v151_v48 = vrot.slane %v150_v44, 1 }
  0xc5   :  { %v190_v49 = vrot.slane %v189_v47, 2  ;;  %215 = vpush %v136_v46 }
  0xc6   :  { %v152_v50 = vadd.f32 %v151_v48, %v150_v44 }
  0xc7   :  { %v191_v51 = vadd.f32 %v190_v49, %v189_v47 }
  0xc8   :  { %217 = vpush %v152_v50 }
  0xc9   :  { %v192_v52 = vrot.slane %v191_v51, 1 }
  0xcb   :  { %v193_v53 = vadd.f32 %v192_v52, %v191_v51 }
  0xcd   :  { %219 = vpush %v193_v53 }
  0xd4   :  { %s212_s1 = spop %211 }
  0xd5   :  { %s37_s21 = smul.f32 0.25, %s212_s1 }
  0xd7   :  { %39 = sst [smem:[#allocation3]] %s37_s21 }
  0xf5   :  { %s214_s22 = spop %213 }
  0xf6   :  { %s97_s23 = smul.f32 0.25, %s214_s22  ;;  %s216_s24 = spop %215 }
  0xf7   :  { %s138_s25 = smul.f32 0.125, %s216_s24 }
  0xf8   :  { %99 = sst [smem:[#allocation3 + $0x1]] %s97_s23 }
  0xf9   :  { %140 = sst [smem:[#allocation3 + $0x2]] %s138_s25  ;;  %s218_s26 = spop %217 }
  0xfa   :  { %s154_s27 = smul.f32 0.125, %s218_s26 }
  0xfc   :  { %156 = sst [smem:[#allocation3 + $0x3]] %s154_s27 }
  0xfe   :  { %s220_s28 = spop %219 }
  0xff   :  { %s195_s29 = smul.f32 0.24999994, %s220_s28 }
 0x101   :  { %197 = sst [smem:[#allocation3 + $0x4]] %s195_s29 }
 0x102   :  { %243 = shalt.err (!%p240_p2)
}
 0x103   :  { %s248_s10 = smov [#allocation3]  }
 0x104   :  { %205 = dma.smem_to_hbm %s248_s10, 16, %s308_s3, [#allocation4]  }
 0x105   :  { %244 = dma.done.wait [#allocation4], 16  }
 0x106   :  { %245 = vsyncadd [#allocation4], 4294967280 }
 0x107   :  { %209 = sfence }
 0x108   :  { %210 = vsyncpa [#allocation4], 1 }

</bundles_post_ra>
